<compile_context>
chip_gen: v7x
topology: tpu7x:2x2x1
jax: 0.10.0
libtpu: 0.0.40
codegen_flags: <defaults>
</compile_context>

<pallas_src>
import jax
import jax.numpy as jnp
from jax.experimental import pallas as pl
from jax.experimental.pallas import tpu as pltpu


def _round_up(x: int, m: int) -> int:
    return (x + m - 1) // m * m


def _concat_embeddor_kernel(words_ref, chars_ref, wtab_ref, ctab_ref, out_ref):
    # words_ref : (TR, 1)       int32   word index per row
    # chars_ref : (TR, C)       int32   char indices per row
    # wtab_ref  : (Vw, D_pad)   table   word table, nonzero lanes [0, Dw)
    # ctab_ref  : (Vc, D_pad)   table   char table, nonzero lanes [Dw, D)
    # out_ref   : (TR, D_pad)   float32 concatenated embeddings (lane-dense)
    TR = words_ref.shape[0]
    C = chars_ref.shape[1]
    Vw = wtab_ref.shape[0]
    Vc = ctab_ref.shape[0]
    tab_dtype = wtab_ref.dtype

    # ---- word path: single 2D one-hot compare (TR, Vw) ----
    w_iota = jax.lax.broadcasted_iota(jnp.int32, (TR, Vw), 1)
    w_onehot = (words_ref[...] == w_iota).astype(tab_dtype)            # (TR, Vw)

    # ---- char path: statically unrolled 2D count accumulation (int32) ----
    c_iota = jax.lax.broadcasted_iota(jnp.int32, (TR, Vc), 1)
    chars = chars_ref[...]                                              # (TR, C)
    counts = (chars[:, 0:1] == c_iota).astype(jnp.int32)
    for k in range(1, C):                                               # static unroll
        counts = counts + (chars[:, k:k + 1] == c_iota).astype(jnp.int32)
    # mean = (counts / C) @ table ; 1/C is a compile-time scalar.
    c_counts = (counts.astype(jnp.float32) * (1.0 / C)).astype(tab_dtype)

    # ---- two MXU matmuls summed into one lane-dense block + single store ----
    out = jnp.dot(w_onehot, wtab_ref[...], preferred_element_type=jnp.float32)
    out = out + jnp.dot(c_counts, ctab_ref[...], preferred_element_type=jnp.float32)
    out_ref[...] = out.astype(out_ref.dtype)


def make_concatenating_embeddor(word_table, char_table, *, row_block=256,
                                use_bf16_tables=False):
    """Build a ConcatenatingEmbeddor forward fn (tables are prepared ONCE here).

    word_table: (Vw, Dw) float, char_table: (Vc, Dc) float.
    Returns forward(words (B, W) int, chars (B, W, C) int) -> (B, W, Dw+Dc) f32.
    """
    Vw, Dw = word_table.shape
    Vc, Dc = char_table.shape
    D = Dw + Dc
    D_pad = _round_up(D, 128)          # lane-dense output: pad to 128 lanes
    # use_bf16_tables halves table VMEM / doubles MXU throughput on v6e/v7x but
    # loses ~3 decimal digits (breaks 1e-5 tolerance) -> default off.
    tab_dtype = jnp.bfloat16 if use_bf16_tables else jnp.float32

    # Hoisted out of the per-call path: padded tables built once.
    #   word rows occupy output lanes [0, Dw); char rows occupy [Dw, D).
    wtab = jnp.zeros((Vw, D_pad), tab_dtype).at[:, :Dw].set(
        word_table.astype(tab_dtype))
    ctab = jnp.zeros((Vc, D_pad), tab_dtype).at[:, Dw:D].set(
        char_table.astype(tab_dtype))

    def _invariant_spec(shape):
        # Grid-invariant block: single-buffer it (halves its VMEM footprint).
        try:
            return pl.BlockSpec(shape, lambda g: (0, 0),
                                pipeline_mode=pl.Buffered(1))
        except TypeError:  # older BlockSpec signature without pipeline_mode
            return pl.BlockSpec(shape, lambda g: (0, 0))

    @jax.jit
    def forward(words, chars):
        B, W = words.shape
        C = chars.shape[2]
        N = B * W
        TR = row_block if N >= row_block else _round_up(N, 8)
        N_pad = _round_up(N, TR)

        # Clamp (jnp.take-under-jit semantics for OOB sentinels), flatten, pad.
        words_c = jnp.clip(words.astype(jnp.int32), 0, Vw - 1).reshape(N, 1)
        chars_c = jnp.clip(chars.astype(jnp.int32), 0, Vc - 1).reshape(N, C)
        words_c = jnp.pad(words_c, ((0, N_pad - N), (0, 0)))
        chars_c = jnp.pad(chars_c, ((0, N_pad - N), (0, 0)))

        # Explicit scoped-VMEM budget: tables (single-buffered) + double-buffered
        # index/output blocks + counts working set, x2 headroom, capped well
        # under the v7x 64 MiB physical limit.
        itemsize = jnp.dtype(tab_dtype).itemsize
        tab_bytes = (Vw + Vc) * D_pad * itemsize
        counts_bytes = TR * (_round_up(Vw, 128) + _round_up(Vc, 128)) * 4
        block_bytes = 2 * TR * _round_up(1 + C, 128) * 4 + 2 * TR * D_pad * 4
        vmem_limit = int(min(48 * 1024 * 1024,
                             2 * (tab_bytes + counts_bytes + block_bytes)
                             + (4 << 20)))

        out_padded = pl.pallas_call(
            _concat_embeddor_kernel,
            out_shape=jax.ShapeDtypeStruct((N_pad, D_pad), jnp.float32),
            grid=(N_pad // TR,),
            in_specs=[
                pl.BlockSpec((TR, 1), lambda g: (g, 0)),     # word ids
                pl.BlockSpec((TR, C), lambda g: (g, 0)),     # char ids
                _invariant_spec((Vw, D_pad)),                # word table
                _invariant_spec((Vc, D_pad)),                # char table
            ],
            out_specs=pl.BlockSpec((TR, D_pad), lambda g: (g, 0)),
            compiler_params=pltpu.CompilerParams(
                dimension_semantics=("parallel",),
                vmem_limit_bytes=vmem_limit),
        )(words_c, chars_c, wtab, ctab)

        return out_padded[:N, :D].reshape(B, W, D)

    return forward


def _reference(words, chars, word_table, char_table):
    word_emb = jnp.take(word_table, words, axis=0)                  # (B, W, Dw)
    char_emb = jnp.take(char_table, chars, axis=0).mean(axis=2)     # (B, W, Dc)
    return jnp.concatenate([word_emb, char_emb], axis=2)


if __name__ == "__main__":
    B, W, C = 2, 8, 8          # batch, max_num_words, max_num_chars
    Vw, Dw = 32, 32            # word vocab / word embedding dim
    Vc, Dc = 16, 32            # char vocab / char embedding dim

    key = jax.random.PRNGKey(0)
    k_words, k_chars, k_wtab, k_ctab = jax.random.split(key, 4)

    words = jax.random.randint(k_words, (B, W), 0, Vw, dtype=jnp.int32)
    chars = jax.random.randint(k_chars, (B, W, C), 0, Vc, dtype=jnp.int32)
    word_table = jax.random.normal(k_wtab, (Vw, Dw), dtype=jnp.float32)
    char_table = jax.random.normal(k_ctab, (Vc, Dc), dtype=jnp.float32)

    embeddor = make_concatenating_embeddor(word_table, char_table)
    out = jax.block_until_ready(embeddor(words, chars))

    ref = _reference(words, chars, word_table, char_table)
    assert out.shape == (B, W, Dw + Dc)
    assert jnp.allclose(out, ref, atol=1e-5, rtol=1e-5), "mismatch vs reference"

    print("KERNEL_OK")
</pallas_src>

<mosaic_0001>
module attributes {stable_mosaic.version = 11 : i64} {
  func.func @_concat_embeddor_kernel(%arg0: i32, %arg1: memref<16x1xi32, #tpu.memory_space<vmem>>, %arg2: memref<16x8xi32, #tpu.memory_space<vmem>>, %arg3: memref<32x128xf32, #tpu.memory_space<vmem>>, %arg4: memref<16x128xf32, #tpu.memory_space<vmem>>, %arg5: memref<16x128xf32, #tpu.memory_space<vmem>>) attributes {dimension_semantics = [#tpu.dimension_semantics<parallel>], iteration_bounds = array<i64: 1>, scalar_prefetch = 0 : i64, scratch_operands = 0 : i64, tpu.core_type = #tpu.core_type<tc>, window_params = [{transform_indices = @transform_0, window_bounds = array<i64: 16, 1>}, {transform_indices = @transform_1, window_bounds = array<i64: 16, 8>}, {pipeline_mode = #tpu.pipeline_mode<synchronous>, transform_indices = @transform_2, window_bounds = array<i64: 32, 128>}, {pipeline_mode = #tpu.pipeline_mode<synchronous>, transform_indices = @transform_3, window_bounds = array<i64: 16, 128>}, {transform_indices = @transform_4, window_bounds = array<i64: 16, 128>}]} {
    %0 = tpu.iota {dimensions = array<i32: 1>} : vector<16x32xi32>
    %c0 = arith.constant 0 : index
    %c0_0 = arith.constant 0 : index
    %1 = vector.load %arg1[%c0, %c0_0] : memref<16x1xi32, #tpu.memory_space<vmem>>, vector<16x1xi32>
    %2 = vector.broadcast %1 : vector<16x1xi32> to vector<16x32xi32>
    %3 = arith.cmpi eq, %2, %0 : vector<16x32xi32>
    %4 = arith.extui %3 : vector<16x32xi1> to vector<16x32xi32>
    %5 = arith.sitofp %4 : vector<16x32xi32> to vector<16x32xf32>
    %6 = tpu.iota {dimensions = array<i32: 1>} : vector<16x16xi32>
    %c0_1 = arith.constant 0 : index
    %c0_2 = arith.constant 0 : index
    %7 = vector.load %arg2[%c0_1, %c0_2] : memref<16x8xi32, #tpu.memory_space<vmem>>, vector<16x8xi32>
    %8 = vector.extract_strided_slice %7 {offsets = [0, 0], sizes = [16, 1], strides = [1, 1]} : vector<16x8xi32> to vector<16x1xi32>
    %9 = vector.broadcast %8 : vector<16x1xi32> to vector<16x16xi32>
    %10 = arith.cmpi eq, %9, %6 : vector<16x16xi32>
    %11 = arith.extui %10 : vector<16x16xi1> to vector<16x16xi32>
    %12 = vector.extract_strided_slice %7 {offsets = [0, 1], sizes = [16, 1], strides = [1, 1]} : vector<16x8xi32> to vector<16x1xi32>
    %13 = vector.broadcast %12 : vector<16x1xi32> to vector<16x16xi32>
    %14 = arith.cmpi eq, %13, %6 : vector<16x16xi32>
    %15 = arith.extui %14 : vector<16x16xi1> to vector<16x16xi32>
    %16 = arith.addi %11, %15 : vector<16x16xi32>
    %17 = vector.extract_strided_slice %7 {offsets = [0, 2], sizes = [16, 1], strides = [1, 1]} : vector<16x8xi32> to vector<16x1xi32>
    %18 = vector.broadcast %17 : vector<16x1xi32> to vector<16x16xi32>
    %19 = arith.cmpi eq, %18, %6 : vector<16x16xi32>
    %20 = arith.extui %19 : vector<16x16xi1> to vector<16x16xi32>
    %21 = arith.addi %16, %20 : vector<16x16xi32>
    %22 = vector.extract_strided_slice %7 {offsets = [0, 3], sizes = [16, 1], strides = [1, 1]} : vector<16x8xi32> to vector<16x1xi32>
    %23 = vector.broadcast %22 : vector<16x1xi32> to vector<16x16xi32>
    %24 = arith.cmpi eq, %23, %6 : vector<16x16xi32>
    %25 = arith.extui %24 : vector<16x16xi1> to vector<16x16xi32>
    %26 = arith.addi %21, %25 : vector<16x16xi32>
    %27 = vector.extract_strided_slice %7 {offsets = [0, 4], sizes = [16, 1], strides = [1, 1]} : vector<16x8xi32> to vector<16x1xi32>
    %28 = vector.broadcast %27 : vector<16x1xi32> to vector<16x16xi32>
    %29 = arith.cmpi eq, %28, %6 : vector<16x16xi32>
    %30 = arith.extui %29 : vector<16x16xi1> to vector<16x16xi32>
    %31 = arith.addi %26, %30 : vector<16x16xi32>
    %32 = vector.extract_strided_slice %7 {offsets = [0, 5], sizes = [16, 1], strides = [1, 1]} : vector<16x8xi32> to vector<16x1xi32>
    %33 = vector.broadcast %32 : vector<16x1xi32> to vector<16x16xi32>
    %34 = arith.cmpi eq, %33, %6 : vector<16x16xi32>
    %35 = arith.extui %34 : vector<16x16xi1> to vector<16x16xi32>
    %36 = arith.addi %31, %35 : vector<16x16xi32>
    %37 = vector.extract_strided_slice %7 {offsets = [0, 6], sizes = [16, 1], strides = [1, 1]} : vector<16x8xi32> to vector<16x1xi32>
    %38 = vector.broadcast %37 : vector<16x1xi32> to vector<16x16xi32>
    %39 = arith.cmpi eq, %38, %6 : vector<16x16xi32>
    %40 = arith.extui %39 : vector<16x16xi1> to vector<16x16xi32>
    %41 = arith.addi %36, %40 : vector<16x16xi32>
    %42 = vector.extract_strided_slice %7 {offsets = [0, 7], sizes = [16, 1], strides = [1, 1]} : vector<16x8xi32> to vector<16x1xi32>
    %43 = vector.broadcast %42 : vector<16x1xi32> to vector<16x16xi32>
    %44 = arith.cmpi eq, %43, %6 : vector<16x16xi32>
    %45 = arith.extui %44 : vector<16x16xi1> to vector<16x16xi32>
    %46 = arith.addi %41, %45 : vector<16x16xi32>
    %47 = arith.sitofp %46 : vector<16x16xi32> to vector<16x16xf32>
    %cst = arith.constant 1.250000e-01 : f32
    %48 = vector.broadcast %cst : f32 to vector<16x16xf32>
    %49 = arith.mulf %47, %48 : vector<16x16xf32>
    %c0_3 = arith.constant 0 : index
    %c0_4 = arith.constant 0 : index
    %50 = vector.load %arg3[%c0_3, %c0_4] : memref<32x128xf32, #tpu.memory_space<vmem>>, vector<32x128xf32>
    %cst_5 = arith.constant dense<0.000000e+00> : vector<16x128xf32>
    %51 = tpu.matmul %5, %50, %cst_5 {dimension_numbers = #tpu.dot_dimension_numbers<[1], [0], [0], [1], [0, 0, 1, 1], [], []>} : vector<16x32xf32>, vector<32x128xf32>, vector<16x128xf32> -> vector<16x128xf32>
    %c0_6 = arith.constant 0 : index
    %c0_7 = arith.constant 0 : index
    %52 = vector.load %arg4[%c0_6, %c0_7] : memref<16x128xf32, #tpu.memory_space<vmem>>, vector<16x128xf32>
    %cst_8 = arith.constant dense<0.000000e+00> : vector<16x128xf32>
    %53 = tpu.matmul %49, %52, %cst_8 {dimension_numbers = #tpu.dot_dimension_numbers<[1], [0], [0], [1], [0, 0, 1, 1], [], []>} : vector<16x16xf32>, vector<16x128xf32>, vector<16x128xf32> -> vector<16x128xf32>
    %54 = arith.addf %51, %53 : vector<16x128xf32>
    %c0_9 = arith.constant 0 : index
    %c0_10 = arith.constant 0 : index
    %55 = vector.load %arg5[%c0_9, %c0_10] : memref<16x128xf32, #tpu.memory_space<vmem>>, vector<16x128xf32>
    tpu.vector_store %arg5[%c0_9, %c0_10], %54 {strides = array<i32>} : memref<16x128xf32, #tpu.memory_space<vmem>>, vector<16x128xf32>,
    return
  }
  func.func @transform_0(%arg0: i32) -> (i32, i32) {
    %c0_i32 = arith.constant 0 : i32
    %c0_i32_0 = arith.constant 0 : i32
    return %arg0, %c0_i32 : i32, i32
  }
  func.func @transform_1(%arg0: i32) -> (i32, i32) {
    %c0_i32 = arith.constant 0 : i32
    %c0_i32_0 = arith.constant 0 : i32
    return %arg0, %c0_i32 : i32, i32
  }
  func.func @transform_2(%arg0: i32) -> (i32, i32) {
    %c0_i32 = arith.constant 0 : i32
    %c0_i32_0 = arith.constant 0 : i32
    %c0_i32_1 = arith.constant 0 : i32
    return %c0_i32, %c0_i32_0 : i32, i32
  }
  func.func @transform_3(%arg0: i32) -> (i32, i32) {
    %c0_i32 = arith.constant 0 : i32
    %c0_i32_0 = arith.constant 0 : i32
    %c0_i32_1 = arith.constant 0 : i32
    return %c0_i32, %c0_i32_0 : i32, i32
  }
  func.func @transform_4(%arg0: i32) -> (i32, i32) {
    %c0_i32 = arith.constant 0 : i32
    %c0_i32_0 = arith.constant 0 : i32
    return %arg0, %c0_i32 : i32, i32
  }
}

</mosaic_0001>

<bundles_post_ra>
// kernel: forward.1
= control target key start
LH: loop header
LB: loop body
LE: loop exit
PB: predicated region body
PF: predicated region fallthrough
CT: control target
= control target key end

     0   :  { %v383_v0 = vmov 0   ;;  %v384_v3 = vmov 1   ;;  %v385_v4 = vmov 2   ;;  %v386_v5 = vmov 3   ;;  %s495_s1 = inlined_call_operand.vmem [shape: s32[16,8], index: 1, kind: input, shape index: {}]   ;;  %s496_s0 = inlined_call_operand.vmem [shape: s32[16,1], index: 0, kind: input, shape index: {}]   ;;  %s497_s2 = inlined_call_operand.vmem [shape: f32[32,128], index: 2, kind: input, shape index: {}]   ;;  %s498_s3 = inlined_call_operand.vmem [shape: f32[16,128], index: 3, kind: input, shape index: {}]   ;;  %s499_s4 = inlined_call_operand.vmem [shape: f32[16,128], index: 4, kind: output, shape index: {}]  }
   0x1   :  { %368 = vset.pattern.permute.xlu1 %v383_v0  ;;  %366 = vset.pattern.permute.xlu0 %v383_v0  ;;  %v34_v1 = vld [vmem:[%s495_s1 + $0x8] sm:$0xff]  ;;  %v33_v2 = vld [vmem:[%s495_s1] sm:$0xff]  ;;  %v387_v6 = vmov 4   ;;  %v388_v7 = vmov 5   ;;  %v389_v8 = vmov 7   ;;  %v390_v10 = vmov 6  }
   0x2   :  { %39 = vperm.xlu1 %368, %v34_v1   ;;  %36 = vperm.xlu0 %366, %v33_v2   ;;  %v20_v9 = vld [vmem:[%s496_s0 + $0x8] sm:$0xff]  ;;  %v133_v11 = vld [vmem:[%s497_s2] sm:$0xff]  ;;  %v135_v16 = vld [vmem:[%s497_s2 + $0x10] sm:$0xff]  ;;  %v17_v25 = vlaneseq  ;;  %vm139_vm15 = vcmask 130048  }
   0x3   :  { %v134_v12 = vld [vmem:[%s497_s2 + $0x8] sm:$0xff]  ;;  %v137_v14 = vld [vmem:[%s498_s3] sm:$0xff]  ;;  %v136_v19 = vld [vmem:[%s497_s2 + $0x18] sm:$0xff] }
   0x4   :  { %v347_v13 = vpack.c.bf16 %v134_v12, %v133_v11  ;;  %v138_v15 = vld [vmem:[%s498_s3 + $0x8] sm:$0xff]  ;;  %v19_v17 = vld [vmem:[%s496_s0] sm:$0xff]  ;;  %v351_v20 = vpack.c.bf16 %v136_v19, %v135_v16  ;;  %v451_v27 = vand.u32 127, %v17_v25  ;;  %v391_v11 = vmov 0.0  }
   0x5   :  { %v343_v18 = vpack.c.bf16 %v138_v15, %v137_v14 }
   0x6   :  { %369 = vset.pattern.permute.xlu1 %v384_v3  ;;  %367 = vset.pattern.permute.xlu0 %v384_v3 }
   0x7   :  { %49 = vperm.xlu1 %369, %v34_v1   ;;  %46 = vperm.xlu0 %367, %v33_v2  }
   0x8   :  { %348 = vmatprep.subr.bf16.mxu0 %v347_v13  ;;  %344 = vmatprep.subr.bf16.mxu1 %v343_v18 }
   0x9   :  { %350 = vmatpush3.bf16.msra.mxu0 %v347_v13  ;;  %346 = vmatpush3.bf16.msra.mxu1 %v343_v18 }
   0xa   :  { %352 = vmatprep.subr.bf16.mxu0 %v351_v20 }
   0xb   :  { %370 = vset.pattern.permute.xlu1 %v385_v4  ;;  %371 = vset.pattern.permute.xlu0 %v385_v4 }
   0xc   :  { %58 = vperm.xlu1 %370, %v33_v2   ;;  %61 = vperm.xlu0 %371, %v34_v1  }
   0xd   :  { %354 = vmatpush3.bf16.msra.mxu0 %v351_v20 }
  0x10   :  { %372 = vset.pattern.permute.xlu1 %v386_v5  ;;  %373 = vset.pattern.permute.xlu0 %v387_v6 }
  0x11   :  { %70 = vperm.xlu1 %372, %v33_v2   ;;  %82 = vperm.xlu0 %373, %v33_v2  }
  0x15   :  { %73 = vperm.xlu1 %372, %v34_v1   ;;  %376 = vset.pattern.permute.xlu0 %v388_v7 }
  0x16   :  { %97 = vperm.xlu0 %376, %v34_v1  }
  0x19   :  { %374 = vset.pattern.permute.xlu1 %v387_v6 }
  0x1a   :  { %85 = vperm.xlu1 %374, %v34_v1   ;;  %378 = vset.pattern.permute.xlu0 %v389_v8 }
  0x1b   :  { %118 = vperm.xlu0 %378, %v33_v2  }
  0x1e   :  { %375 = vset.pattern.permute.xlu1 %v388_v7 }
  0x1f   :  { %94 = vperm.xlu1 %375, %v33_v2   ;;  %381 = vset.pattern.permute.xlu0 %v383_v0 }
  0x20   :  { %25 = vperm.xlu0 %381, %v20_v9  }
  0x23   :  { %377 = vset.pattern.permute.xlu1 %v390_v10 }
  0x24   :  { %106 = vperm.xlu1 %377, %v33_v2   ;;  %382 = vset.pattern.permute.xlu0 %v389_v8 }
  0x28   :  { %109 = vperm.xlu1 %377, %v34_v1  }
  0x2c   :  { %379 = vset.pattern.permute.xlu1 %v389_v8 }
  0x2d   :  { %121 = vperm.xlu1 %379, %v34_v1  }
  0x31   :  { %380 = vset.pattern.permute.xlu1 %v383_v0 }
  0x32   :  { %22 = vperm.xlu1 %380, %v19_v17  }
  0x81   :  { %v40_v21 = vpop.permute.xlu1 %39  ;;  %v37_v23 = vpop.permute.xlu0 %36 }
  0x82   :  { %vm41_vm0 = vcmp.eq.s32.totalorder %v37_v23, %v451_v27  ;;  %vm42_vm6 = vcmp.eq.s32.totalorder %v40_v21, %v451_v27 }
  0x83   :  { %v43_v31 = vsel %vm41_vm0, 1, %v383_v0  ;;  %v44_v45 = vsel %vm42_vm6, 1, %v383_v0 }
  0x86   :  { %v50_v22 = vpop.permute.xlu1 %49  ;;  %v47_v26 = vpop.permute.xlu0 %46 }
  0x87   :  { %vm51_vm1 = vcmp.eq.s32.totalorder %v47_v26, %v451_v27  ;;  %vm52_vm4 = vcmp.eq.s32.totalorder %v50_v22, %v451_v27 }
  0x88   :  { %v53_v32 = vsel %vm51_vm1, 1, %v383_v0  ;;  %v54_v40 = vsel %vm52_vm4, 1, %v383_v0 }
  0x89   :  { %v55_v34 = vadd.s32 %v53_v32, %v43_v31  ;;  %v56_v47 = vadd.s32 %v54_v40, %v44_v45 }
  0x8b   :  { %v59_v24 = vpop.permute.xlu1 %58  ;;  %v62_v29 = vpop.permute.xlu0 %61 }
  0x8c   :  { %vm63_vm2 = vcmp.eq.s32.totalorder %v59_v24, %v451_v27  ;;  %vm64_vm7 = vcmp.eq.s32.totalorder %v62_v29, %v451_v27 }
  0x8d   :  { %v65_v35 = vsel %vm63_vm2, 1, %v383_v0  ;;  %v66_v46 = vsel %vm64_vm7, 1, %v383_v0  ;;  %vm221_vm2 = vcmask 261120  }
  0x8e   :  { %v67_v39 = vadd.s32 %v65_v35, %v55_v34  ;;  %v68_v51 = vadd.s32 %v66_v46, %v56_v47 }
  0x90   :  { %v71_v28 = vpop.permute.xlu1 %70  ;;  %v83_v33 = vpop.permute.xlu0 %82 }
  0x91   :  { %vm75_vm3 = vcmp.eq.s32.totalorder %v71_v28, %v451_v27  ;;  %vm87_vm5 = vcmp.eq.s32.totalorder %v83_v33, %v451_v27 }
  0x92   :  { %v77_v37 = vsel %vm75_vm3, 1, %v383_v0  ;;  %v89_v43 = vsel %vm87_vm5, 1, %v383_v0 }
  0x93   :  { %v79_v41 = vadd.s32 %v77_v37, %v67_v39 }
  0x94   :  { %v74_v30 = vpop.permute.xlu1 %73 }
  0x95   :  { %v98_v38 = vpop.permute.xlu0 %97  ;;  %vm76_vm8 = vcmp.eq.s32.totalorder %v74_v30, %v451_v27  ;;  %v91_v49 = vadd.s32 %v89_v43, %v79_v41 }
  0x96   :  { %v78_v50 = vsel %vm76_vm8, 1, %v383_v0  ;;  %vm100_vm13 = vcmp.eq.s32.totalorder %v98_v38, %v451_v27 }
  0x97   :  { %v80_v55 = vadd.s32 %v78_v50, %v68_v51  ;;  %v102_v61 = vsel %vm100_vm13, 1, %v383_v0 }
  0x99   :  { %v86_v36 = vpop.permute.xlu1 %85 }
  0x9a   :  { %v119_v44 = vpop.permute.xlu0 %118  ;;  %vm88_vm10 = vcmp.eq.s32.totalorder %v86_v36, %v451_v27 }
  0x9b   :  { %vm123_vm11 = vcmp.eq.s32.totalorder %v119_v44, %v451_v27  ;;  %v90_v53 = vsel %vm88_vm10, 1, %v383_v0 }
  0x9c   :  { %v125_v57 = vsel %vm123_vm11, 1, %v383_v0  ;;  %v92_v59 = vadd.s32 %v90_v53, %v80_v55 }
  0x9e   :  { %v95_v42 = vpop.permute.xlu1 %94  ;;  %v104_v2 = vadd.s32 %v102_v61, %v92_v59 }
  0x9f   :  { %vm99_vm9 = vcmp.eq.s32.totalorder %v95_v42, %v451_v27  ;;  %v26_v5 = vpop.permute.xlu0 %25 }
  0xa0   :  { %v101_v48 = vsel %vm99_vm9, 1, %v383_v0  ;;  %vm28_vm1 = vcmp.eq.s32.totalorder %v26_v5, %v451_v27 }
  0xa1   :  { %v103_v54 = vadd.s32 %v101_v48, %v91_v49  ;;  %v310_v12 = vsel %vm28_vm1, 1.0, %v391_v11 }
  0xa3   :  { %v107_v52 = vpop.permute.xlu1 %106 }
  0xa4   :  { %vm111_vm12 = vcmp.eq.s32.totalorder %v107_v52, %v451_v27 }
  0xa5   :  { %v113_v56 = vsel %vm111_vm12, 1, %v383_v0 }
  0xa6   :  { %v115_v58 = vadd.s32 %v113_v56, %v103_v54 }
  0xa7   :  { %v110_v60 = vpop.permute.xlu1 %109 }
  0xa8   :  { %vm112_vm14 = vcmp.eq.s32.totalorder %v110_v60, %v451_v27  ;;  %v127_v62 = vadd.s32 %v125_v57, %v115_v58 }
  0xa9   :  { %v114_v63 = vsel %vm112_vm14, 1, %v383_v0 }
  0xaa   :  { %v129_v1 = vcvt.s32.f32 %v127_v62  ;;  %v116_v6 = vadd.s32 %v114_v63, %v104_v2 }
  0xac   :  { %v122_v3 = vpop.permute.xlu1 %121  ;;  %v131_v4 = vmul.f32 0.125, %v129_v1 }
  0xad   :  { %vm124_vm0 = vcmp.eq.s32.totalorder %v122_v3, %v451_v27 }
  0xae   :  { %v126_v7 = vsel %vm124_vm0, 1, %v383_v0  ;;  %329 = vmatprep.mubr.msk.f32.mxu1 %vm139_vm15, %v131_v4 }
  0xaf   :  { %v128_v8 = vadd.s32 %v126_v7, %v116_v6 }
  0xb1   :  { %v130_v9 = vcvt.s32.f32 %v128_v8  ;;  %v23_v10 = vpop.permute.xlu1 %22 }
  0xb2   :  { %vm27_vm3 = vcmp.eq.s32.totalorder %v23_v10, %v451_v27 }
  0xb3   :  { %v132_v13 = vmul.f32 0.125, %v130_v9  ;;  %v309_v14 = vsel %vm27_vm3, 1.0, %v391_v11 }
  0xb4   :  { %340 = vmatprep.mubr.msk.f32.mxu0 %vm221_vm2, %v309_v14 }
  0xb5   :  { %330 = vmatmul.mubr.msk.f32.vlgmr.msra.gmra.mrb[0].mxu1 %vm139_vm15, %v132_v13  ;;  %341 = vmatmul.mubr.msk.f32.vlgmr.msra.gmra.mrb[0].mxu0 %vm221_vm2, %v310_v12 }
 0x188   :  { %v331_v15 = vpop.f32.mrb[0].mxu1  ;;  %v342_v0 = vpop.f32.mrb[0].mxu0 }
 0x189   :  { %v300_v16 = vadd.f32 %v342_v0, %v331_v15  ;;  %v212_v17 = vpop.f32.mrb[1].mxu1  ;;  %v294_v18 = vpop.f32.mrb[1].mxu0 }
 0x18a   :  { %v295_v19 = vadd.f32 %v294_v18, %v212_v17 }
 0x18b   :  { %304 = vst [vmem:[%s499_s4 + $0x8] sm:$0xff] %v300_v16 }
 0x18c   :  { %303 = vst [vmem:[%s499_s4] sm:$0xff] %v295_v19 }

</bundles_post_ra>
